<compile_context>
chip_gen: v5e
topology: v5e:2x2
jax: 0.10.0
libtpu: 0.0.40
codegen_flags: <defaults>
</compile_context>

<pallas_src>
import math

import jax
import jax.numpy as jnp
from jax.experimental import pallas as pl
from jax.experimental.pallas import tpu as pltpu

# ---- module hyper-parameters (mirroring AttnWrapper.__init__) ----------------
EMBED_DIM = 32
NUM_HEADS = 8
HEAD_DIM = EMBED_DIM // NUM_HEADS
WINDOW_SIZE_PARAM = 5                        # ctor arg `window_size`
DILATION_GAP_PARAM = 1                       # ctor arg `dilation_gap`
HALF_WINDOW = (WINDOW_SIZE_PARAM - 1) // 2   # self.window_size
GAP = DILATION_GAP_PARAM + 1                 # self.dilation_gap
OVERLAP = HALF_WINDOW * GAP                  # self.overlap
# offsets of each window position inside the halo'd sequence (0 .. 2*OVERLAP)
WINDOW_OFFSETS = tuple(
    OVERLAP + i
    for i in (list(range(-OVERLAP, 0, GAP)) +
              list(range(GAP, OVERLAP + GAP, GAP))))
W = len(WINDOW_OFFSETS)                      # key positions per token (= 4)
assert W & (W - 1) == 0, "tree-halving lane reductions assume W is a power of 2"


def _round_up(x, m):
    return (x + m - 1) // m * m


def _pick_tile_l(lmax, num_blocks):
    # Large tiles amortise the ~0.35us per-grid-step overhead (this kernel is
    # step-overhead bound); cap at 1024 to keep double-buffered per-step VMEM
    # around 1 MiB.  With a single text block, also cap so the j axis keeps
    # >= 2 tiles (second v7x TensorCore).
    cap = 1024
    if num_blocks == 1:
        cap = min(cap, max(8, _round_up((lmax + 1) // 2, 8)))
    return max(8, min(cap, _round_up(lmax, 8)))


def _pack_constants():
    """Resident constants for the packed score / value matmuls."""
    we, wh = W * EMBED_DIM, W * NUM_HEADS
    r = jnp.arange(we)            # packed row index   w*E + e
    c = jnp.arange(wh)            # packed score index w*H + h
    # head-sum: (w*E+e, w'*H+h) = 1 iff same window and e belongs to head h
    hsum = ((r[:, None] // EMBED_DIM == c[None, :] // NUM_HEADS) &
            ((r[:, None] % EMBED_DIM) // HEAD_DIM == c[None, :] % NUM_HEADS)
            ).astype(jnp.float32)                                   # [W*E, W*H]
    # spread: (w*H+h, w'*E+e) = 1/NUM_HEADS iff same window (head-mean + lane bcast)
    spread = (c[:, None] // NUM_HEADS == r[None, :] // EMBED_DIM
              ).astype(jnp.float32) * (1.0 / NUM_HEADS)             # [W*H, W*E]
    return hsum, spread


# ------------------------------ Pallas kernel --------------------------------
def _attn_pallas(q_b, k_win_b, v_win_b, hsum, spread, tile_l):
    """q_b: [B, Lp, E]; *_win_b: [B, Lp//TILE_L, TILE_L+pad, E] -> attn [B, Lp, E]."""
    B, Lp, E = q_b.shape
    nj = k_win_b.shape[1]
    tlp = k_win_b.shape[2]
    WE = W * E
    WH = W * NUM_HEADS

    def kernel(q_ref, kw_ref, vw_ref, hsum_ref, spread_ref, out_ref):
        q = q_ref[...]                          # [TL, E] (already scaled)
        kwin = kw_ref[...]                      # [TL+pad, E]
        vwin = vw_ref[...]                      # [TL+pad, E]

        # Packed q ⊙ k_off slab -> one lane-dense MXU matmul for all W offsets.
        qk = jnp.concatenate(
            [q * kwin[off:off + tile_l] for off in WINDOW_OFFSETS], axis=-1)   # [TL, W*E]
        s = jnp.dot(qk, hsum_ref[...],
                    preferred_element_type=jnp.float32)                        # [TL, W*H]

        # Softmax over the W window positions, per head (columns are w-major).
        m = s
        width = WH
        while width > NUM_HEADS:                # tree-halving lane reduce (W is 2^k)
            width //= 2
            m = jnp.maximum(m[:, :width], m[:, width:])
        ex = jnp.exp(s - jnp.concatenate([m] * W, axis=-1))     # one EUP pass, 32 lanes
        d = ex
        width = WH
        while width > NUM_HEADS:
            width //= 2
            d = d[:, :width] + d[:, width:]                      # [TL, H] denominator
        inv = pl.reciprocal(d, approx=True)                      # EUP slot
        inv = inv * (2.0 - d * inv)                              # one Newton step
        p = ex * jnp.concatenate([inv] * W, axis=-1)             # [TL, W*H] probs

        # Head-mean weights broadcast to E lanes per window via one matmul,
        # then fused value accumulation on 128-lane operands.
        wvec = jnp.dot(p, spread_ref[...],
                       preferred_element_type=jnp.float32)                     # [TL, W*E]
        vpack = jnp.concatenate(
            [vwin[off:off + tile_l] for off in WINDOW_OFFSETS], axis=-1)        # [TL, W*E]
        acc = wvec * vpack
        width = WE
        while width > E:
            width //= 2
            acc = acc[:, :width] + acc[:, width:]
        out_ref[...] = acc                                                      # [TL, E]

    grid = (B, nj)
    return pl.pallas_call(
        kernel,
        out_shape=jax.ShapeDtypeStruct((B, Lp, E), jnp.float32),
        grid_spec=pltpu.PrefetchScalarGridSpec(
            num_scalar_prefetch=0,
            grid=grid,
            in_specs=[
                pl.BlockSpec((None, tile_l, E), lambda b, j: (b, j, 0)),        # q
                pl.BlockSpec((None, None, tlp, E), lambda b, j: (b, j, 0, 0)),  # k window
                pl.BlockSpec((None, None, tlp, E), lambda b, j: (b, j, 0, 0)),  # v window
                pl.BlockSpec((WE, WH), lambda b, j: (0, 0)),                    # hsum
                pl.BlockSpec((WH, WE), lambda b, j: (0, 0)),                    # spread
            ],
            out_specs=pl.BlockSpec((None, tile_l, E), lambda b, j: (b, j, 0)),
        ),
        compiler_params=pltpu.CompilerParams(
            dimension_semantics=("parallel", "parallel")),
    )(q_b, k_win_b, v_win_b, hsum, spread)


# ------------------------------- JAX glue -------------------------------------
def attn_wrapper_forward(text_blocks, params):
    """text_blocks: list of (begin, main, end) raw encodings, each [n_i, E]."""
    E = EMBED_DIM
    sizes = [(b.shape[0], m.shape[0], e.shape[0]) for b, m, e in text_blocks]
    merged = jnp.concatenate(
        [jnp.concatenate([b, m, e], axis=0) for b, m, e in text_blocks], axis=0)
    # wrapped model over the flattened input (glue).
    model_out = merged @ params["model_w"].T + params["model_b"]
    # hoisted k in-projection: every token is projected exactly once.
    k_out = model_out @ params["wk"].T + params["bk"]

    scale = 1.0 / math.sqrt(HEAD_DIM)

    lmax = max(nm for _, nm, _ in sizes)
    B = len(sizes)
    tile_l = _pick_tile_l(lmax, B)
    lp = _round_up(lmax, tile_l)
    pad_ov = _round_up(2 * OVERLAP, 8)
    tlp = tile_l + pad_ov
    nj = lp // tile_l

    # per-tile overlapping halo windows -> halo VMEM is O(TILE_L), not O(Lp)
    win_idx = jnp.arange(nj)[:, None] * tile_l + jnp.arange(tlp)[None, :]   # [nj, TLP]

    q_list, kw_list, vw_list, mains = [], [], [], []
    off = 0
    for nb, nm, ne in sizes:
        assert nb >= OVERLAP and ne >= OVERLAP, "begin/end must cover the overlap"
        blk_v = model_out[off:off + nb + nm + ne]
        blk_k = k_out[off:off + nb + nm + ne]
        off += nb + nm + ne
        main = blk_v[nb:nb + nm]
        mains.append(main)
        # q in-projection hoisted to glue; 1/sqrt(head_dim) folded in.
        q = (main @ params["wq"].T + params["bq"]) * scale
        q_list.append(jnp.pad(q, ((0, lp - nm), (0, 0))))
        halo_v = blk_v[nb - OVERLAP:nb + nm + OVERLAP]      # [nm + 2*OVERLAP, E]
        halo_k = blk_k[nb - OVERLAP:nb + nm + OVERLAP]
        halo_pad = lp + pad_ov - (nm + 2 * OVERLAP)
        halo_v = jnp.pad(halo_v, ((0, halo_pad), (0, 0)))
        halo_k = jnp.pad(halo_k, ((0, halo_pad), (0, 0)))
        kw_list.append(halo_k[win_idx])                      # [nj, TLP, E]
        vw_list.append(halo_v[win_idx])

    q_b = jnp.stack(q_list)          # [B, Lp, E]
    k_win_b = jnp.stack(kw_list)     # [B, nj, TLP, E]
    v_win_b = jnp.stack(vw_list)

    hsum, spread = _pack_constants()

    attn_b = _attn_pallas(q_b, k_win_b, v_win_b, hsum, spread, tile_l)

    outs = []
    for i, (nb, nm, ne) in enumerate(sizes):
        outs.append(jnp.concatenate([mains[i], attn_b[i, :nm]], axis=-1))
    return jnp.concatenate(outs, axis=0)                    # [sum L_i, 2E]


# --------------------------- pure-JAX reference --------------------------------
def build_key(begin, main, end):
    """Dilated-window key construction of AttnWrapper.forward -> [W, L, E]."""
    keys = []
    for i in range(-OVERLAP, 0, GAP):
        keys.append(jnp.concatenate([begin[i:], main[:i]], axis=0))
    for i in range(GAP, OVERLAP + GAP, GAP):
        keys.append(jnp.concatenate([main[i:], end[:i]], axis=0))
    return jnp.stack(keys, axis=0)


def ref_block(main, key_wle, params):
    L = main.shape[0]
    q = main @ params["wq"].T + params["bq"]
    k = jnp.einsum("wle,fe->wlf", key_wle, params["wk"]) + params["bk"]
    qh = q.reshape(L, NUM_HEADS, HEAD_DIM)
    kh = k.reshape(W, L, NUM_HEADS, HEAD_DIM)
    s = jnp.einsum("lhd,wlhd->wlh", qh, kh) / math.sqrt(HEAD_DIM)
    p = jax.nn.softmax(s, axis=0)
    wts = p.mean(axis=-1)                                   # [W, L]
    attn = jnp.einsum("wl,wle->le", wts, key_wle)
    return jnp.concatenate([main, attn], axis=-1)


def ref_forward(text_blocks, params):
    sizes = [(b.shape[0], m.shape[0], e.shape[0]) for b, m, e in text_blocks]
    merged = jnp.concatenate(
        [jnp.concatenate([b, m, e], axis=0) for b, m, e in text_blocks], axis=0)
    model_out = merged @ params["model_w"].T + params["model_b"]
    encodings, off = [], 0
    for nb, nm, ne in sizes:
        begin = model_out[off:off + nb]
        main = model_out[off + nb:off + nb + nm]
        end = model_out[off + nb + nm:off + nb + nm + ne]
        off += nb + nm + ne
        encodings.append(ref_block(main, build_key(begin, main, end), params))
    return jnp.concatenate(encodings, axis=0)


# ----------------------------------- main --------------------------------------
if __name__ == "__main__":
    E = EMBED_DIM
    rng = jax.random.PRNGKey(0)
    ks = jax.random.split(rng, 12)

    params = {
        # synthetic wrapped model: Linear(E, E)
        "model_w": jax.random.normal(ks[0], (E, E), jnp.float32) * 0.1,
        "model_b": jax.random.normal(ks[1], (E,), jnp.float32) * 0.01,
        # MultiheadAttention in-projection (only q / k are used by the wrapper)
        "wq": jax.random.normal(ks[2], (E, E), jnp.float32) / math.sqrt(E),
        "wk": jax.random.normal(ks[3], (E, E), jnp.float32) / math.sqrt(E),
        "bq": jax.random.normal(ks[4], (1, E), jnp.float32) * 0.02,
        "bk": jax.random.normal(ks[5], (1, E), jnp.float32) * 0.02,
    }

    # two TextBlocks: begin [OVERLAP, E], main [16, E], end [OVERLAP, E]
    L = 16
    text_blocks = []
    for bi in range(2):
        kb, km, ke = jax.random.split(ks[6 + bi], 3)
        text_blocks.append((
            jax.random.normal(kb, (OVERLAP, E), jnp.float32),
            jax.random.normal(km, (L, E), jnp.float32),
            jax.random.normal(ke, (OVERLAP, E), jnp.float32),
        ))

    out = attn_wrapper_forward(text_blocks, params)
    out = jax.block_until_ready(out)

    ref = ref_forward(text_blocks, params)
    assert out.shape == (2 * L, 2 * E), out.shape
    max_err = float(jnp.max(jnp.abs(out - ref)))
    # 1e-3: approx reciprocal + Newton step and reordered f32 matmuls vs ref.
    assert max_err < 1e-3, f"mismatch vs reference: {max_err}"

    print("KERNEL_OK")
</pallas_src>

<mosaic_0001>
module attributes {stable_mosaic.version = 11 : i64} {
  func.func @kernel(%arg0: i32, %arg1: i32, %arg2: memref<1x16x32xf32, #tpu.memory_space<vmem>>, %arg3: memref<1x1x24x32xf32, #tpu.memory_space<vmem>>, %arg4: memref<1x1x24x32xf32, #tpu.memory_space<vmem>>, %arg5: memref<128x32xf32, #tpu.memory_space<vmem>>, %arg6: memref<32x128xf32, #tpu.memory_space<vmem>>, %arg7: memref<1x16x32xf32, #tpu.memory_space<vmem>>) attributes {dimension_semantics = [#tpu.dimension_semantics<parallel>, #tpu.dimension_semantics<parallel>], iteration_bounds = array<i64: 2, 1>, scalar_prefetch = 0 : i64, scratch_operands = 0 : i64, tpu.core_type = #tpu.core_type<tc>, window_params = [{transform_indices = @transform_0, window_bounds = array<i64: 1, 16, 32>}, {transform_indices = @transform_1, window_bounds = array<i64: 1, 1, 24, 32>}, {transform_indices = @transform_2, window_bounds = array<i64: 1, 1, 24, 32>}, {pipeline_mode = #tpu.pipeline_mode<synchronous>, transform_indices = @transform_3, window_bounds = array<i64: 128, 32>}, {pipeline_mode = #tpu.pipeline_mode<synchronous>, transform_indices = @transform_4, window_bounds = array<i64: 32, 128>}, {transform_indices = @transform_5, window_bounds = array<i64: 1, 16, 32>}]} {
    %c0 = arith.constant 0 : index
    %c0_0 = arith.constant 0 : index
    %c0_1 = arith.constant 0 : index
    %0 = vector.load %arg2[%c0, %c0_0, %c0_1] : memref<1x16x32xf32, #tpu.memory_space<vmem>>, vector<1x16x32xf32>
    %1 = vector.shape_cast %0 : vector<1x16x32xf32> to vector<16x32xf32>
    %c0_2 = arith.constant 0 : index
    %c0_3 = arith.constant 0 : index
    %c0_4 = arith.constant 0 : index
    %c0_5 = arith.constant 0 : index
    %2 = vector.load %arg3[%c0_2, %c0_3, %c0_4, %c0_5] : memref<1x1x24x32xf32, #tpu.memory_space<vmem>>, vector<1x1x24x32xf32>
    %3 = vector.shape_cast %2 : vector<1x1x24x32xf32> to vector<24x32xf32>
    %c0_6 = arith.constant 0 : index
    %c0_7 = arith.constant 0 : index
    %c0_8 = arith.constant 0 : index
    %c0_9 = arith.constant 0 : index
    %4 = vector.load %arg4[%c0_6, %c0_7, %c0_8, %c0_9] : memref<1x1x24x32xf32, #tpu.memory_space<vmem>>, vector<1x1x24x32xf32>
    %5 = vector.shape_cast %4 : vector<1x1x24x32xf32> to vector<24x32xf32>
    %6 = vector.extract_strided_slice %3 {offsets = [0, 0], sizes = [16, 32], strides = [1, 1]} : vector<24x32xf32> to vector<16x32xf32>
    %7 = arith.mulf %1, %6 : vector<16x32xf32>
    %8 = vector.extract_strided_slice %3 {offsets = [2, 0], sizes = [16, 32], strides = [1, 1]} : vector<24x32xf32> to vector<16x32xf32>
    %9 = arith.mulf %1, %8 : vector<16x32xf32>
    %10 = vector.extract_strided_slice %3 {offsets = [6, 0], sizes = [16, 32], strides = [1, 1]} : vector<24x32xf32> to vector<16x32xf32>
    %11 = arith.mulf %1, %10 : vector<16x32xf32>
    %12 = vector.extract_strided_slice %3 {offsets = [8, 0], sizes = [16, 32], strides = [1, 1]} : vector<24x32xf32> to vector<16x32xf32>
    %13 = arith.mulf %1, %12 : vector<16x32xf32>
    %14 = tpu.concatenate %7, %9, %11, %13 in 1 : vector<16x32xf32>, vector<16x32xf32>, vector<16x32xf32>, vector<16x32xf32> -> vector<16x128xf32>
    %c0_10 = arith.constant 0 : index
    %c0_11 = arith.constant 0 : index
    %15 = vector.load %arg5[%c0_10, %c0_11] : memref<128x32xf32, #tpu.memory_space<vmem>>, vector<128x32xf32>
    %cst = arith.constant dense<0.000000e+00> : vector<16x32xf32>
    %16 = tpu.matmul %14, %15, %cst {dimension_numbers = #tpu.dot_dimension_numbers<[1], [0], [0], [1], [0, 0, 1, 1], [], []>} : vector<16x128xf32>, vector<128x32xf32>, vector<16x32xf32> -> vector<16x32xf32>
    %17 = vector.extract_strided_slice %16 {offsets = [0, 0], sizes = [16, 16], strides = [1, 1]} : vector<16x32xf32> to vector<16x16xf32>
    %18 = vector.extract_strided_slice %16 {offsets = [0, 16], sizes = [16, 16], strides = [1, 1]} : vector<16x32xf32> to vector<16x16xf32>
    %19 = arith.maximumf %17, %18 : vector<16x16xf32>
    %20 = vector.extract_strided_slice %19 {offsets = [0, 0], sizes = [16, 8], strides = [1, 1]} : vector<16x16xf32> to vector<16x8xf32>
    %21 = vector.extract_strided_slice %19 {offsets = [0, 8], sizes = [16, 8], strides = [1, 1]} : vector<16x16xf32> to vector<16x8xf32>
    %22 = arith.maximumf %20, %21 : vector<16x8xf32>
    %23 = tpu.concatenate %22, %22, %22, %22 in 1 : vector<16x8xf32>, vector<16x8xf32>, vector<16x8xf32>, vector<16x8xf32> -> vector<16x32xf32>
    %24 = arith.subf %16, %23 : vector<16x32xf32>
    %25 = math.exp %24 : vector<16x32xf32>
    %26 = vector.extract_strided_slice %25 {offsets = [0, 0], sizes = [16, 16], strides = [1, 1]} : vector<16x32xf32> to vector<16x16xf32>
    %27 = vector.extract_strided_slice %25 {offsets = [0, 16], sizes = [16, 16], strides = [1, 1]} : vector<16x32xf32> to vector<16x16xf32>
    %28 = arith.addf %26, %27 : vector<16x16xf32>
    %29 = vector.extract_strided_slice %28 {offsets = [0, 0], sizes = [16, 8], strides = [1, 1]} : vector<16x16xf32> to vector<16x8xf32>
    %30 = vector.extract_strided_slice %28 {offsets = [0, 8], sizes = [16, 8], strides = [1, 1]} : vector<16x16xf32> to vector<16x8xf32>
    %31 = arith.addf %29, %30 : vector<16x8xf32>
    %32 = tpu.reciprocal %31 {approx = true} : vector<16x8xf32> -> vector<16x8xf32>
    %33 = arith.mulf %31, %32 : vector<16x8xf32>
    %cst_12 = arith.constant 2.000000e+00 : f32
    %34 = vector.broadcast %cst_12 : f32 to vector<16x8xf32>
    %35 = arith.subf %34, %33 : vector<16x8xf32>
    %36 = arith.mulf %32, %35 : vector<16x8xf32>
    %37 = tpu.concatenate %36, %36, %36, %36 in 1 : vector<16x8xf32>, vector<16x8xf32>, vector<16x8xf32>, vector<16x8xf32> -> vector<16x32xf32>
    %38 = arith.mulf %25, %37 : vector<16x32xf32>
    %c0_13 = arith.constant 0 : index
    %c0_14 = arith.constant 0 : index
    %39 = vector.load %arg6[%c0_13, %c0_14] : memref<32x128xf32, #tpu.memory_space<vmem>>, vector<32x128xf32>
    %cst_15 = arith.constant dense<0.000000e+00> : vector<16x128xf32>
    %40 = tpu.matmul %38, %39, %cst_15 {dimension_numbers = #tpu.dot_dimension_numbers<[1], [0], [0], [1], [0, 0, 1, 1], [], []>} : vector<16x32xf32>, vector<32x128xf32>, vector<16x128xf32> -> vector<16x128xf32>
    %41 = vector.extract_strided_slice %5 {offsets = [0, 0], sizes = [16, 32], strides = [1, 1]} : vector<24x32xf32> to vector<16x32xf32>
    %42 = vector.extract_strided_slice %5 {offsets = [2, 0], sizes = [16, 32], strides = [1, 1]} : vector<24x32xf32> to vector<16x32xf32>
    %43 = vector.extract_strided_slice %5 {offsets = [6, 0], sizes = [16, 32], strides = [1, 1]} : vector<24x32xf32> to vector<16x32xf32>
    %44 = vector.extract_strided_slice %5 {offsets = [8, 0], sizes = [16, 32], strides = [1, 1]} : vector<24x32xf32> to vector<16x32xf32>
    %45 = tpu.concatenate %41, %42, %43, %44 in 1 : vector<16x32xf32>, vector<16x32xf32>, vector<16x32xf32>, vector<16x32xf32> -> vector<16x128xf32>
    %46 = arith.mulf %40, %45 : vector<16x128xf32>
    %47 = vector.extract_strided_slice %46 {offsets = [0, 0], sizes = [16, 64], strides = [1, 1]} : vector<16x128xf32> to vector<16x64xf32>
    %48 = vector.extract_strided_slice %46 {offsets = [0, 64], sizes = [16, 64], strides = [1, 1]} : vector<16x128xf32> to vector<16x64xf32>
    %49 = arith.addf %47, %48 : vector<16x64xf32>
    %50 = vector.extract_strided_slice %49 {offsets = [0, 0], sizes = [16, 32], strides = [1, 1]} : vector<16x64xf32> to vector<16x32xf32>
    %51 = vector.extract_strided_slice %49 {offsets = [0, 32], sizes = [16, 32], strides = [1, 1]} : vector<16x64xf32> to vector<16x32xf32>
    %52 = arith.addf %50, %51 : vector<16x32xf32>
    %c0_16 = arith.constant 0 : index
    %c0_17 = arith.constant 0 : index
    %c0_18 = arith.constant 0 : index
    %53 = vector.load %arg7[%c0_16, %c0_17, %c0_18] : memref<1x16x32xf32, #tpu.memory_space<vmem>>, vector<1x16x32xf32>
    %54 = vector.shape_cast %53 : vector<1x16x32xf32> to vector<16x32xf32>
    %55 = vector.shape_cast %52 : vector<16x32xf32> to vector<1x16x32xf32>
    tpu.vector_store %arg7[%c0_16, %c0_17, %c0_18], %55 {strides = array<i32>} : memref<1x16x32xf32, #tpu.memory_space<vmem>>, vector<1x16x32xf32>,
    return
  }
  func.func @transform_0(%arg0: i32, %arg1: i32) -> (i32, i32, i32) {
    %c0_i32 = arith.constant 0 : i32
    %c0_i32_0 = arith.constant 0 : i32
    return %arg0, %arg1, %c0_i32 : i32, i32, i32
  }
  func.func @transform_1(%arg0: i32, %arg1: i32) -> (i32, i32, i32, i32) {
    %c0_i32 = arith.constant 0 : i32
    %c0_i32_0 = arith.constant 0 : i32
    %c0_i32_1 = arith.constant 0 : i32
    return %arg0, %arg1, %c0_i32, %c0_i32_0 : i32, i32, i32, i32
  }
  func.func @transform_2(%arg0: i32, %arg1: i32) -> (i32, i32, i32, i32) {
    %c0_i32 = arith.constant 0 : i32
    %c0_i32_0 = arith.constant 0 : i32
    %c0_i32_1 = arith.constant 0 : i32
    return %arg0, %arg1, %c0_i32, %c0_i32_0 : i32, i32, i32, i32
  }
  func.func @transform_3(%arg0: i32, %arg1: i32) -> (i32, i32) {
    %c0_i32 = arith.constant 0 : i32
    %c0_i32_0 = arith.constant 0 : i32
    %c0_i32_1 = arith.constant 0 : i32
    return %c0_i32, %c0_i32_0 : i32, i32
  }
  func.func @transform_4(%arg0: i32, %arg1: i32) -> (i32, i32) {
    %c0_i32 = arith.constant 0 : i32
    %c0_i32_0 = arith.constant 0 : i32
    %c0_i32_1 = arith.constant 0 : i32
    return %c0_i32, %c0_i32_0 : i32, i32
  }
  func.func @transform_5(%arg0: i32, %arg1: i32) -> (i32, i32, i32) {
    %c0_i32 = arith.constant 0 : i32
    %c0_i32_0 = arith.constant 0 : i32
    return %arg0, %arg1, %c0_i32 : i32, i32, i32
  }
}

</mosaic_0001>

<bundles_post_ra>
// kernel: tpu_custom_call.1
= control target key start
LH: loop header
LB: loop body
LE: loop exit
PB: predicated region body
PF: predicated region fallthrough
CT: control target
= control target key end

     0   :  { %10 = vsyncpa [#allocation3], 0  ;;  %s1289_s0 = inlined_call_operand.vmem [shape: f32[2,16,32], index: 0, kind: input, shape index: {}]   ;;  %s1290_s1 = inlined_call_operand.vmem [shape: f32[2,1,24,32], index: 1, kind: input, shape index: {}]   ;;  %s1291_s2 = inlined_call_operand.vmem [shape: f32[2,1,24,32], index: 2, kind: input, shape index: {}]   ;;  %s1292_s3 = inlined_call_operand.vmem [shape: f32[128,32], index: 3, kind: input, shape index: {}]   ;;  %s1293_s4 = inlined_call_operand.vmem [shape: f32[32,128], index: 4, kind: input, shape index: {}]   ;;  %s1294_s5 = inlined_call_operand.hbm [shape: f32[2,16,32], index: 5, kind: output, shape index: {}]  }
   0x1   :  { %12 = vsyncpa [#allocation3 + $0x1], 0  ;;  %s1015_s18 = smov 0   ;;  %s1017_s19 = smov 0  }
   0x2   :  { %s1019_s20 = smov 0   ;;  %s1021_s21 = smov 0  }
   0x3   :  { %s1023_s22 = smov 0   ;;  %s1025_s23 = smov 0  }
   0x4 LB: > { %s773_s24 = sadd.s32 4294967295, %s974_s23   ;;  %s774_s25 = sadd.s32 4294967294, %s974_s23   ;;  %s974_s23 = sphi %s1025_s23, %s18_s23   ;;  %s970_s22 = sphi %s1023_s22, %s1306_s22   ;;  %s966_s21 = sphi %s1021_s21, %s1305_s21   ;;  %s962_s20 = sphi %s1019_s20, %s1304_s20   ;;  %s958_s19 = sphi %s1017_s19, %s1303_s19   ;;  %s954_s18 = sphi %s1015_s18, %s1302_s18  }
   0x5   : > { %s30_s26 = sadd.s32 1, %s970_s22  ;;  %s165_s27 = sadd.s32 1, %s962_s20 }
   0x6   : > { %p32_p0 = scmp.ge.s32.totalorder %s30_s26, 2  ;;  %p175_p1 = scmp.ne.s32.totalorder %s962_s20, %s958_s19 }
   0x7   : > { %p176_p2 = scmp.eq.s32.totalorder %s773_s24, 1  ;;  %p181_p3 = scmp.ne.s32.totalorder %s958_s19, %s954_s18 }
   0x8   : > { %s1308_s26 = smov (%p32_p0, %s30_s26), 0  ;;  %p182_p5 = scmp.eq.s32.totalorder %s774_s25, 1 }
   0x9   : > { %p1055_p4 = por %p176_p2, %p175_p1  ;;  %s160_s29 = ssub.s32 %s970_s22, %s1308_s26 }
   0xa   : > { %p777_p6 = scmp.ge.s32.totalorder %s974_s23, 1  ;;  %p163_p7 = scmp.eq.s32.totalorder %s160_s29, 0 }
   0xb   : > { %p1062_p8 = por %p182_p5, %p181_p3  ;;  %p243_p9 = scmp.lt.s32.totalorder %s974_s23, 3 }
   0xc   : > { %s1068_s6 = scalar_select %p163_p7, %s962_s20, %s165_s27  }
   0xd   : > { %p244_p10 = pnand %p777_p6, %p243_p9 }
   0xe   : > { %p294_p11 = scmp.lt.s32.totalorder (!%p244_p10), %s966_s21, 1  ;;  %s1295_s25 = smov (!%p244_p10), 96  }
   0xf   : > { %247 = sbr.rel (%p244_p10) target bundleno = 1343 (0x53f), region = 40  ;;  %s977_s7 = smov (!%p244_p10), 32  }
  0x10   : > { %s978_s10 = smov (!%p244_p10), 64   ;;  %s980_s16 = smov (!%p244_p10), 120  }
  0x11   : > { %s981_s17 = smov (!%p244_p10), 24   ;;  %s982_s24 = smov (!%p244_p10), 16  }
  0x14   : > { %v405_v0 = vld [vmem:[%s1292_s3 + $0x78] sm:$0xff]  ;;  %v404_v1 = vld [vmem:[%s1292_s3 + $0x70] sm:$0xff]  ;;  %s1078_s11 = scalar_select %p294_p11, %s966_s21, 1  ;;  %v403_v2 = vld [vmem:[%s1292_s3 + $0x68] sm:$0xff]  ;;  %vm335_vm0 = vcmask 1045504   ;;  %vm345_vm1 = vcmask 1041408  }
  0x15   : > { %406 = vmatpush.msra.mxu0 %v405_v0  ;;  %792 = vmatpush.msra.mxu2 %v405_v0  ;;  %v402_v3 = vld [vmem:[%s1292_s3 + $0x60] sm:$0xff]  ;;  %v401_v4 = vld [vmem:[%s1292_s3 + $0x58] sm:$0xff]  ;;  %v400_v5 = vld [vmem:[%s1292_s3 + $0x50] sm:$0xff]  ;;  %vm381_vm2 = vcmask 261120   ;;  %vm384_vm3 = vcmask 523264   ;;  %vm387_vm4 = vcmask 785408  }
  0x16   : > { %s790_s14 = sshll.u32 %s1078_s11, 4  ;;  %s808_s15 = smul.u32 24, %s1078_s11  ;;  %v399_v21 = vld [vmem:[%s1292_s3 + $0x48] sm:$0xff]  ;;  %v398_v27 = vld [vmem:[%s1292_s3 + $0x40] sm:$0xff]  ;;  %v397_v29 = vld [vmem:[%s1292_s3 + $0x38] sm:$0xff]  ;;  %vm469_vm5 = vcmask 64512  }
  0x17   : > { %407 = vmatpush.msra.mxu0 %v404_v1  ;;  %793 = vmatpush.msra.mxu2 %v404_v1  ;;  %s301_s27 = scalar_lea.vmem %s1289_s0, %s790_s14  ;;  %v396_v32 = vld [vmem:[%s1292_s3 + $0x30] sm:$0xff]  ;;  %v395_v34 = vld [vmem:[%s1292_s3 + $0x28] sm:$0xff]  ;;  %v394_v35 = vld [vmem:[%s1292_s3 + $0x20] sm:$0xff]  ;;  %s979_s14 = smov 112   ;;  %vm472_vm6 = vcmask 130048   ;;  %vm475_vm7 = vcmask 195584  }
  0x18   : > { %s311_s8 = scalar_lea.vmem %s1290_s1, %s808_s15  ;;  %v1106_v9 = vld [vmem:[%s301_s27] sm:$0xff]  ;;  %v1108_v10 = vld [vmem:[%s301_s27 + $0x8] sm:$0xff]  ;;  %v393_v36 = vld [vmem:[%s1292_s3 + $0x18] sm:$0xff]  ;;  %s1297_s27 = smov 8  }
  0x19   : > { %408 = vmatpush.msra.mxu0 %v403_v2  ;;  %794 = vmatpush.msra.mxu2 %v403_v2  ;;  %v1102_v6 = vld [vmem:[%s311_s8] sm:$0xff]  ;;  %v1104_v7 = vld [vmem:[%s311_s8 + $0x8] sm:$0xff]  ;;  %v326_v8 = vld [vmem:[%s311_s8 + $0x10] sm:$0xff]  ;;  %s1300_s11 = smov 96  }
  0x1a   : > { %v336_v11 = vrot.slane %v1102_v6, 2  ;;  %v337_v12 = vrot.slane %v1104_v7, 2  ;;  %v339_v13 = vrot.slane %v326_v8, 2  ;;  %v346_v14 = vrot.slane %v1102_v6, 6  ;;  %v392_v37 = vld [vmem:[%s1292_s3 + $0x10] sm:$0xff]  ;;  %v391_v38 = vld [vmem:[%s1292_s3 + $0x8] sm:$0xff] }
  0x1b   : > { %409 = vmatpush.msra.mxu0 %v402_v3  ;;  %795 = vmatpush.msra.mxu2 %v402_v3  ;;  %v347_v15 = vrot.slane %v1104_v7, 6  ;;  %v349_v16 = vrot.slane %v326_v8, 6  ;;  %v355_v17 = vmul.f32 %v1104_v7, %v1106_v9  ;;  %v356_v18 = vmul.f32 %v326_v8, %v1108_v10  ;;  %v390_v39 = vld [vmem:[%s1292_s3] sm:$0xff] }
  0x1c   : > { %v338_v19 = vsel %vm335_vm0, %v336_v11, %v337_v12  ;;  %v340_v20 = vsel %vm335_vm0, %v337_v12, %v339_v13  ;;  %v330_v44 = vmul.f32 %v1102_v6, %v1106_v9  ;;  %v331_v45 = vmul.f32 %v1104_v7, %v1108_v10 }
  0x1d   : > { %410 = vmatpush.msra.mxu0 %v401_v4  ;;  %796 = vmatpush.msra.mxu2 %v401_v4  ;;  %v343_v22 = vmul.f32 %v338_v19, %v1106_v9  ;;  %v344_v23 = vmul.f32 %v340_v20, %v1108_v10  ;;  %v348_v24 = vsel %vm345_vm1, %v346_v14, %v347_v15 }
  0x1e   : > { %v350_v25 = vsel %vm345_vm1, %v347_v15, %v349_v16  ;;  %v883_v26 = vpack.i.bf16 %v356_v18, %v355_v17  ;;  %v353_v30 = vmul.f32 %v348_v24, %v1106_v9 }
  0x1f   : > { %411 = vmatpush.msra.mxu0 %v400_v5  ;;  %797 = vmatpush.msra.mxu2 %v400_v5  ;;  %v873_v28 = vpack.i.bf16 %v344_v23, %v343_v22  ;;  %v354_v31 = vmul.f32 %v350_v25, %v1108_v10 }
  0x20   : > { %884 = vrot.lane.b32.xlu1 %v883_v26, %s1295_s25 }
  0x21   : > { %412 = vmatpush.msra.mxu0 %v399_v21  ;;  %798 = vmatpush.msra.mxu2 %v399_v21  ;;  %v878_v33 = vpack.i.bf16 %v354_v31, %v353_v30 }
  0x22   : > { %874 = vrot.lane.b32.xlu0 %v873_v28, %s977_s7 }
  0x23   : > { %413 = vmatpush.msra.mxu0 %v398_v27  ;;  %799 = vmatpush.msra.mxu2 %v398_v27 }
  0x25   : > { %414 = vmatpush.msra.mxu0 %v397_v29  ;;  %800 = vmatpush.msra.mxu2 %v397_v29 }
  0x27   : > { %415 = vmatpush.msra.mxu0 %v396_v32  ;;  %801 = vmatpush.msra.mxu2 %v396_v32 }
  0x29   : > { %416 = vmatpush.msra.mxu0 %v395_v34  ;;  %802 = vmatpush.msra.mxu2 %v395_v34 }
  0x2a   : > { %879 = vrot.lane.b32.xlu0 %v878_v33, %s978_s10 }
  0x2b   : > { %417 = vmatpush.msra.mxu0 %v394_v35  ;;  %803 = vmatpush.msra.mxu2 %v394_v35 }
  0x2d   : > { %418 = vmatpush.msra.mxu0 %v393_v36  ;;  %804 = vmatpush.msra.mxu2 %v393_v36 }
  0x2f   : > { %419 = vmatpush.msra.mxu0 %v392_v37  ;;  %805 = vmatpush.msra.mxu2 %v392_v37  ;;  %v543_v37 = vld [vmem:[%s1293_s4 + $0x18] sm:$0xff] }
  0x30   : > { %562 = vmatpush.msra.mxu1 %v543_v37 }
  0x31   : > { %420 = vmatpush.msra.mxu0 %v391_v38  ;;  %806 = vmatpush.msra.mxu2 %v391_v38  ;;  %v542_v38 = vld [vmem:[%s1293_s4 + $0x10] sm:$0xff] }
  0x32   : > { %563 = vmatpush.msra.mxu1 %v542_v38 }
  0x33   : > { %421 = vmatpush.msra.mxu0 %v390_v39  ;;  %807 = vmatpush.msra.mxu2 %v390_v39  ;;  %v541_v39 = vld [vmem:[%s1293_s4 + $0x8] sm:$0xff] }
  0x34   : > { %564 = vmatpush.msra.mxu1 %v541_v39 }
  0x92   : > { %v885_v41 = vpop.permute.xlu1 %884 }
  0x93   : > { %v887_v47 = vunpack.i.h.bf16 %v885_v41  ;;  %v886_v48 = vunpack.i.l.bf16 %v885_v41 }
  0x94   : > { %v875_v40 = vpop.permute.xlu0 %874 }
  0x95   : > { %v877_v42 = vunpack.i.h.bf16 %v875_v40  ;;  %v876_v43 = vunpack.i.l.bf16 %v875_v40  ;;  %v540_v40 = vld [vmem:[%s1293_s4] sm:$0xff] }
  0x96   : > { %565 = vmatpush.msra.mxu1 %v540_v40 }
  0x97   : > { %v382_v51 = vsel %vm381_vm2, %v330_v44, %v876_v43  ;;  %v383_v52 = vsel %vm381_vm2, %v331_v45, %v877_v42 }
  0x9c   : > { %v880_v46 = vpop.permute.xlu0 %879 }
  0x9d   : > { %v882_v49 = vunpack.i.h.bf16 %v880_v46  ;;  %v881_v50 = vunpack.i.l.bf16 %v880_v46 }
  0x9f   : > { %v385_v53 = vsel %vm384_vm3, %v382_v51, %v881_v50  ;;  %v386_v54 = vsel %vm384_vm3, %v383_v52, %v882_v49 }
  0xa0   : > { %v388_v55 = vsel %vm387_vm4, %v385_v53, %v886_v48  ;;  %v389_v56 = vsel %vm387_vm4, %v386_v54, %v887_v47 }
  0xa1   : > { %422 = vmatmul.f32.vlgmr.msra.gmra.mxu0 %v388_v55  ;;  %425 = vmatmul.f32.vlgmr.msra.gmra.mxu2 %v389_v56 }
 0x11e   : > { %v423_v57 = vpop.f32.mrf.mxu0 }
 0x11f   : > { %431 = vrot.lane.b32.xlu1 %v423_v57, %s979_s14 }
 0x124   : > { %v426_v58 = vpop.f32.mrf.mxu2 }
 0x125   : > { %433 = vrot.lane.b32.xlu2 %v426_v58, %s979_s14 }
 0x17f   : > { %v434_v59 = vpop.permute.xlu2 %433 }
 0x180   : > { %v438_v60 = vmax.f32 %v426_v58, %v434_v59 }
 0x182   : > { %443 = vrot.lane.b32.xlu0 %v438_v60, %s980_s16 }
 0x191   : > { %v432_v61 = vpop.permute.xlu1 %431 }
 0x192   : > { %v437_v62 = vmax.f32 %v423_v57, %v432_v61 }
 0x194   : > { %441 = vrot.lane.b32.xlu2 %v437_v62, %s980_s16 }
 0x1ee   : > { %v442_v63 = vpop.permute.xlu2 %441 }
 0x1ef   : > { %v447_v0 = vmax.f32 %v437_v62, %v442_v63 }
 0x1f1   : > { %463 = vrot.lane.b32.xlu0 %v447_v0, %s981_s17  ;;  %457 = vrot.lane.b32.xlu2 %v447_v0, %s982_s24 }
 0x1f2   : > { %451 = vrot.lane.b32.xlu1 %v447_v0, %s1297_s27 }
 0x1f4   : > { %v444_v1 = vpop.permute.xlu0 %443 }
 0x1f5   : > { %v448_v2 = vmax.f32 %v438_v60, %v444_v1 }
 0x1f9   : > { %465 = vrot.lane.b32.xlu0 %v448_v2, %s981_s17  ;;  %459 = vrot.lane.b32.xlu2 %v448_v2, %s982_s24 }
 0x1fa   : > { %453 = vrot.lane.b32.xlu1 %v448_v2, %s1297_s27 }
 0x24b   : > { %v458_v3 = vpop.permute.xlu2 %457 }
 0x253   : > { %v460_v12 = vpop.permute.xlu2 %459 }
 0x263   : > { %v464_v4 = vpop.permute.xlu0 %463 }
 0x264   : > { %v452_v5 = vpop.permute.xlu1 %451 }
 0x265   : > { %v470_v6 = vsel %vm469_vm5, %v447_v0, %v452_v5 }
 0x266   : > { %v473_v7 = vsel %vm472_vm6, %v470_v6, %v458_v3 }
 0x267   : > { %v476_v8 = vsel %vm475_vm7, %v473_v7, %v464_v4 }
 0x268   : > { %v478_v9 = vsub.f32 %v423_v57, %v476_v8 }
 0x26a   : > { %v480_v10 = vmul.f32 1.442695, %v478_v9 }
 0x26b   : > { %v466_v14 = vpop.permute.xlu0 %465 }
 0x26c   : > { %888 = vpow2.f32 %v480_v10  ;;  %v454_v11 = vpop.permute.xlu1 %453 }
 0x26d   : > { %v471_v13 = vsel %vm469_vm5, %v448_v2, %v454_v11 }
 0x26e   : > { %v474_v15 = vsel %vm472_vm6, %v471_v13, %v460_v12 }
 0x26f   : > { %v477_v16 = vsel %vm475_vm7, %v474_v15, %v466_v14 }
 0x270   : > { %v479_v17 = vsub.f32 %v426_v58, %v477_v16 }
 0x272   : > { %v1184_v18 = vpop.eup %888  ;;  %v482_v19 = vmul.f32 1.442695, %v479_v17 }
 0x273   : > { %486 = vrot.lane.b32.xlu1 %v1184_v18, %s979_s14 }
 0x274   : > { %890 = vpow2.f32 %v482_v19 }
 0x27a   : > { %v1188_v20 = vpop.eup %890 }
 0x27b   : > { %488 = vrot.lane.b32.xlu2 %v1188_v20, %s979_s14 }
 0x2d5   : > { %v489_v21 = vpop.permute.xlu2 %488 }
 0x2d6   : > { %v493_v22 = vadd.f32 %v1188_v20, %v489_v21 }
 0x2d8   : > { %498 = vrot.lane.b32.xlu1 %v493_v22, %s980_s16 }
 0x2e5   : > { %v487_v23 = vpop.permute.xlu1 %486 }
 0x2e6   : > { %v492_v24 = vadd.f32 %v1184_v18, %v487_v23 }
 0x2e8   : > { %496 = vrot.lane.b32.xlu0 %v492_v24, %s980_s16  ;;  %s320_s16 = scalar_lea.vmem %s1291_s2, %s808_s15  ;;  %s290_s15 = sand.u32 1, %s958_s19  }
 0x2e9   : > { %v328_v41 = vld [vmem:[%s320_s16 + $0x8] sm:$0xff]  ;;  %v329_v42 = vld [vmem:[%s320_s16 + $0x10] sm:$0xff]  ;;  %v327_v45 = vld [vmem:[%s320_s16] sm:$0xff]  ;;  %s778_s25 = sshll.u32 %s290_s15, 4  ;;  %s635_s13 = scalar_lea.sflag [#allocation3], %s290_s15 }
 0x2ea   : > { %v577_v43 = vrot.slane %v328_v41, 2  ;;  %v579_v44 = vrot.slane %v329_v42, 2  ;;  %v587_v47 = vrot.slane %v327_v45, 6  ;;  %v588_v48 = vrot.slane %v328_v41, 6 }
 0x2eb   : > { %v576_v50 = vrot.slane %v327_v45, 2  ;;  %v590_v52 = vrot.slane %v329_v42, 6 }
 0x2ec   : > { %v580_v46 = vsel %vm335_vm0, %v577_v43, %v579_v44  ;;  %v589_v49 = vsel %vm345_vm1, %v587_v47, %v588_v48 }
 0x2ed   : > { %v578_v51 = vsel %vm335_vm0, %v576_v50, %v577_v43  ;;  %v591_v53 = vsel %vm345_vm1, %v588_v48, %v590_v52 }
 0x34a   : > { %v499_v25 = vpop.permute.xlu1 %498 }
 0x34b   : > { %v503_v27 = vadd.f32 %v499_v25, %v493_v22 }
 0x35a   : > { %v497_v26 = vpop.permute.xlu0 %496 }
 0x35b   : > { %v502_v28 = vadd.f32 %v497_v26, %v492_v24 }
 0x35d   : > { %892 = vrcp.f32 %v502_v28 }
 0x35e   : > { %894 = vrcp.f32 %v503_v27 }
 0x363   : > { %v893_v29 = vpop.eup %892 }
 0x364   : > { %v506_v30 = vmul.f32 %v893_v29, %v502_v28  ;;  %v895_v31 = vpop.eup %894 }
 0x365   : > { %v507_v33 = vmul.f32 %v895_v31, %v503_v27 }
 0x366   : > { %v508_v32 = vsub.f32 2.0, %v506_v30 }
 0x367   : > { %v509_v35 = vsub.f32 2.0, %v507_v33 }
 0x368   : > { %v510_v34 = vmul.f32 %v893_v29, %v508_v32 }
 0x369   : > { %v511_v36 = vmul.f32 %v895_v31, %v509_v35 }
 0x36a   : > { %526 = vrot.lane.b32.xlu1 %v510_v34, %s981_s17  ;;  %520 = vrot.lane.b32.xlu0 %v510_v34, %s982_s24 }
 0x36b   : > { %514 = vrot.lane.b32.xlu2 %v510_v34, %s1297_s27 }
 0x372   : > { %528 = vrot.lane.b32.xlu1 %v511_v36, %s981_s17  ;;  %522 = vrot.lane.b32.xlu0 %v511_v36, %s982_s24  ;;  %s916_s24 = scalar_lea.hbm %s1294_s5, 32 }
 0x373   : > { %516 = vrot.lane.b32.xlu2 %v511_v36, %s1297_s27  ;;  %s292_s27 = scalar_lea.vmem [#allocation2], %s778_s25 }
 0x374   : > { %s649_s9 = sshll.u32 %s292_s27, 4  ;;  %s650_s9 = int_to_ptr.vmem [resolvable:$true] %s649_s9 }
 0x37a   : > { %583 = vrot.lane.b32.xlu0 %v580_v46, %s977_s7  ;;  %592 = vrot.lane.b32.xlu1 %v589_v49, %s978_s10 }
 0x37b   : > { %581 = vrot.lane.b32.xlu2 %v578_v51, %s977_s7  ;;  %s791_s7 = sshll.u32 %s966_s21, 4 }
 0x382   : > { %598 = vrot.lane.b32.xlu0 %v328_v41, %s1300_s11  ;;  %600 = vrot.lane.b32.xlu1 %v329_v42, %s1300_s11 }
 0x383   : > { %594 = vrot.lane.b32.xlu2 %v591_v53, %s978_s10 }
 0x3c5   : > { %v515_v54 = vpop.permute.xlu2 %514 }
 0x3c6   : > { %v532_v55 = vsel %vm469_vm5, %v510_v34, %v515_v54 }
 0x3cd   : > { %v517_v61 = vpop.permute.xlu2 %516 }
 0x3ce   : > { %v533_v62 = vsel %vm469_vm5, %v511_v36, %v517_v61 }
 0x3d5   : > { %v582_v5 = vpop.permute.xlu2 %581 }
 0x3d6   : > { %v604_v6 = vsel %vm381_vm2, %v327_v45, %v582_v5 }
 0x3dc   : > { %v521_v56 = vpop.permute.xlu0 %520  ;;  %v527_v57 = vpop.permute.xlu1 %526 }
 0x3dd   : > { %v534_v58 = vsel %vm472_vm6, %v532_v55, %v521_v56  ;;  %v595_v14 = vpop.permute.xlu2 %594 }
 0x3de   : > { %v536_v59 = vsel %vm475_vm7, %v534_v58, %v527_v57 }
 0x3df   : > { %v538_v60 = vmul.f32 %v1184_v18, %v536_v59 }
 0x3e1   : > { %783 = vmatmul.msk.f32.vlgmr.msra.gmra.mxu1 %vm381_vm2, %v538_v60 }
 0x3e4   : > { %v523_v63 = vpop.permute.xlu0 %522  ;;  %v529_v0 = vpop.permute.xlu1 %528 }
 0x3e5   : > { %v535_v1 = vsel %vm472_vm6, %v533_v62, %v523_v63 }
 0x3e6   : > { %v537_v2 = vsel %vm475_vm7, %v535_v1, %v529_v0 }
 0x3e7   : > { %v539_v3 = vmul.f32 %v1188_v20, %v537_v2 }
 0x3e9   : > { %784 = vmatmul.msk.f32.gmra.mxu1 %vm381_vm2, %v539_v3 }
 0x3ec   : > { %v584_v4 = vpop.permute.xlu0 %583  ;;  %v593_v7 = vpop.permute.xlu1 %592 }
 0x3ed   : > { %v606_v8 = vsel %vm384_vm3, %v604_v6, %v593_v7  ;;  %v605_v13 = vsel %vm381_vm2, %v328_v41, %v584_v4 }
 0x3ee   : > { %v607_v15 = vsel %vm384_vm3, %v605_v13, %v595_v14 }
 0x3f4   : > { %v599_v9 = vpop.permute.xlu0 %598  ;;  %v601_v16 = vpop.permute.xlu1 %600 }
 0x3f5   : > { %v608_v10 = vsel %vm387_vm4, %v606_v8, %v599_v9  ;;  %v609_v18 = vsel %vm387_vm4, %v607_v15, %v601_v16 }
 0x45e   : > { %v567_v11 = vpop.f32.mrf.mxu1 }
 0x45f   : > { %v610_v12 = vmul.f32 %v608_v10, %v567_v11 }
 0x461   : > { %614 = vrot.lane.b32.xlu2 %v610_v12, %s978_s10 }
 0x466   : > { %v570_v17 = vpop.f32.mrf.mxu1 }
 0x467   : > { %v611_v19 = vmul.f32 %v609_v18, %v570_v17 }
 0x469   : > { %616 = vrot.lane.b32.xlu0 %v611_v19, %s978_s10  ;;  %s648_s10 = scalar_lea.hbm %s1294_s5, %s791_s7 }
 0x46a   : > { %s651_s12 = sshll.u32 %s648_s10, 4  ;;  %s652_s12 = int_to_ptr.hbm [resolvable:$true] %s651_s12 }
 0x46b   : > { %s910_s14 = sshra.s32 %s652_s12, 4  ;;  %s911_s14 = int_to_ptr.hbm [resolvable:$true] %s910_s14 }
 0x46c   : > { %s912_s21 = scalar_lea.hbm %s911_s14, 16  ;;  %p917_p1 = scmp.lt.s32.totalorder %s911_s14, %s1294_s5 }
 0x46d   : > { %p913_p12 = scmp.ne.s32.totalorder %s911_s14, %s912_s21  ;;  %p918_p2 = scmp.lt.s32.totalorder %s916_s24, %s912_s21 }
 0x46f   : > { %p914_p13 = pnand %p913_p12, %p1055_p4  ;;  %p919_p3 = por %p918_p2, %p917_p1 }
 0x471   : > { %p915_p0 = pneg %p914_p13 }
 0x473   : > { %p920_p5 = pnand %p919_p3, %p915_p0 }
 0x4bb   : > { %v615_v20 = vpop.permute.xlu2 %614 }
 0x4bc   : > { %v620_v21 = vadd.f32 %v615_v20, %v610_v12 }
 0x4be   : > { %624 = vrot.lane.b32.xlu1 %v620_v21, %s1300_s11 }
 0x4db   : > { %v617_v22 = vpop.permute.xlu0 %616 }
 0x4dc   : > { %v621_v23 = vadd.f32 %v617_v22, %v611_v19 }
 0x4de   : > { %626 = vrot.lane.b32.xlu2 %v621_v23, %s1300_s11 }
 0x530   : > { %v625_v24 = vpop.permute.xlu1 %624 }
 0x531   : > { %v630_v25 = vadd.f32 %v625_v24, %v620_v21 }
 0x533   : > { %632 = vst.msk [vmem:[%s292_s27] sm:$0xff] %vm381_vm2, %v630_v25 }
 0x538   : > { %v627_v26 = vpop.permute.xlu2 %626 }
 0x539   : > { %v631_v27 = vadd.f32 %v627_v26, %v621_v23 }
 0x53b   : > { %633 = vst.msk [vmem:[%s292_s27 + $0x8] sm:$0xff] %vm381_vm2, %v631_v27 }
 0x53c   : > { %923 = shalt.err (!%p920_p5)
}
 0x53d   : > { %s984_s15 = smov 128   ;;  %s1301_s7 = smov 8  }
 0x53e   : > { %809 = dma.vmem_to_hbm [thread:$0]  (%p1055_p4), %s650_s9, 256, %s652_s12, %s635_s13, %s984_s15, %s984_s15, %s1301_s7  }
 0x53f PF: > { %p815_p6 = scmp.ge.s32.totalorder %s974_s23, 2  ;;  %s666_s27 = sand.u32 1, %s954_s18  }
 0x540   : > { %s667_s29 = scalar_lea.sflag [#allocation3], %s666_s27 }
 0x541   : > { %p812_p7 = pnand %p815_p6, %p1062_p8 }
 0x543   : > { %p813_p9 = pneg %p812_p7 }
 0x545   : > { %949 = dma.done.wait (%p813_p9), %s667_s29, 256  }
 0x546   : > { %951 = vsyncadd (%p813_p9), %s667_s29, 4294967040  ;;  %s18_s23 = sadd.s32 1, %s974_s23   ;;  %s1302_s18 = smov %s958_s19 }
 0x547   : > { %p15_p10 = scmp.ge.s32.totalorder %s18_s23, 4   ;;  %s1303_s19 = smov %s962_s20 }
 0x548   : > { %s1304_s20 = smov %s1068_s6  ;;  %s1305_s21 = smov %s970_s22 }
 0x549   : > { %s1306_s22 = smov %s1308_s26  ;;  %17 = sbr.rel (!%p15_p10) target bundleno = 4 (0x4), region = 81 }
 0x54e   :  { %673 = vsyncpa [#allocation3], 1 }
 0x54f   :  { %675 = vsyncpa [#allocation3 + $0x1], 1 }

</bundles_post_ra>
